<compile_context>
chip_gen: v6e
topology: v6e:2x2x1
jax: 0.10.0
libtpu: 0.0.40
codegen_flags: <defaults>
</compile_context>

<pallas_src>
import numpy as np
import jax
import jax.numpy as jnp
from jax.experimental import pallas as pl
from jax.experimental.pallas import tpu as pltpu


def _round_up(x, m):
    return -(-x // m) * m


# ----------------------------------------------------------------------------
# Fused kernel: backbone (Flatten+Linear+ReLU) + class-mean prototypes + scores
# ----------------------------------------------------------------------------
def _fused_proto_kernel(xs_ref, xq_ref, w_ref, b_ref, oht_ref, invc_ref,
                        out_ref, acc_s_ref, acc_q_ref):
    k = pl.program_id(0)

    @pl.when(k == 0)
    def _():
        acc_s_ref[...] = jnp.zeros_like(acc_s_ref)
        acc_q_ref[...] = jnp.zeros_like(acc_q_ref)

    # Backbone matmul, accumulated over K tiles (weight block loaded once per k).
    w = w_ref[...]                                             # [tk, D]
    acc_s_ref[...] += jnp.dot(xs_ref[...], w,
                              preferred_element_type=jnp.float32)
    acc_q_ref[...] += jnp.dot(xq_ref[...], w,
                              preferred_element_type=jnp.float32)

    # Epilogue on the last K step: bias + ReLU, prototypes, -cdist scores.
    @pl.when(k == pl.num_programs(0) - 1)
    def _():
        b = b_ref[...]                                         # [1, D]
        zs = jnp.maximum(acc_s_ref[...] + b, 0.0)              # [Ns_pad, D]
        zq = jnp.maximum(acc_q_ref[...] + b, 0.0)              # [Nq_pad, D]

        # Class-mean prototypes: one-hot already transposed, counts pre-inverted.
        proto = jnp.dot(oht_ref[...], zs,
                        preferred_element_type=jnp.float32)    # [n_way, D]
        proto = proto * invc_ref[...]                          # [n_way, D]

        # scores = -cdist(zq, proto), MXU form (no [Nq, n_way, D] intermediate).
        q_sq = jnp.sum(zq * zq, axis=-1, keepdims=True)        # [Nq_pad, 1]
        p_sq = jnp.sum(proto * proto, axis=-1)                 # [n_way]
        cross = jax.lax.dot_general(
            zq, proto, (((1,), (1,)), ((), ())),
            preferred_element_type=jnp.float32)                # [Nq_pad, n_way]
        d2 = q_sq + p_sq[None, :] - 2.0 * cross
        d2 = jnp.maximum(d2, 0.0)                              # guard cancellation
        out_ref[...] = -jnp.sqrt(d2)


def prototypical_scores(xs, xq, w, b, oht, invc):
    """xs/xq: [N_pad, Din_pad] flattened+padded images, w: [Din_pad, D],
    b: [1, D], oht: [n_way, Ns_pad] transposed one-hot, invc: [n_way, 1]."""
    ns_pad, din_pad = xs.shape
    nq_pad = xq.shape[0]
    d = w.shape[1]
    n_way = oht.shape[0]

    tk = 512 if din_pad % 512 == 0 else 128
    nk = din_pad // tk

    return pl.pallas_call(
        _fused_proto_kernel,
        grid=(nk,),
        in_specs=[
            pl.BlockSpec((ns_pad, tk), lambda k: (0, k)),     # support rows
            pl.BlockSpec((nq_pad, tk), lambda k: (0, k)),     # query rows
            pl.BlockSpec((tk, d), lambda k: (k, 0)),          # weight K-tile
            pl.BlockSpec((1, d), lambda k: (0, 0)),           # bias
            pl.BlockSpec((n_way, ns_pad), lambda k: (0, 0)),  # one-hot^T
            pl.BlockSpec((n_way, 1), lambda k: (0, 0)),       # 1/counts
        ],
        out_specs=pl.BlockSpec((nq_pad, n_way), lambda k: (0, 0)),
        out_shape=jax.ShapeDtypeStruct((nq_pad, n_way), jnp.float32),
        scratch_shapes=[
            pltpu.VMEM((ns_pad, d), jnp.float32),             # support feature acc
            pltpu.VMEM((nq_pad, d), jnp.float32),             # query feature acc
        ],
        compiler_params=pltpu.CompilerParams(
            dimension_semantics=("arbitrary",)),              # K is a reduction
    )(xs, xq, w, b, oht, invc)


# ----------------------------------------------------------------------------
# PrototypicalNetworks forward
# ----------------------------------------------------------------------------
def prototypical_forward(params, support_images, support_labels, query_images,
                         n_way=None):
    w, b = params
    ns = support_images.shape[0]
    nq = query_images.shape[0]
    din, d = w.shape

    if n_way is None:
        # TODO(synk): host sync; prefer passing n_way statically per episode.
        n_way = int(len(np.unique(np.asarray(support_labels))))

    # Flatten NCHW -> [N, C*H*W] (plain JAX glue, matches torch.nn.Flatten).
    xs = support_images.reshape(ns, -1).astype(jnp.float32)
    xq = query_images.reshape(nq, -1).astype(jnp.float32)

    # Padding: rows to sublane multiples of 8, reduction dim to the K tile.
    tk = 512 if din >= 512 else _round_up(din, 128)
    din_pad = _round_up(din, tk)
    ns_pad = _round_up(ns, 8)
    nq_pad = _round_up(nq, 8)

    xs = jnp.pad(xs, ((0, ns_pad - ns), (0, din_pad - din)))
    xq = jnp.pad(xq, ((0, nq_pad - nq), (0, din_pad - din)))
    w_p = jnp.pad(w.astype(jnp.float32), ((0, din_pad - din), (0, 0)))
    b_p = b.reshape(1, d).astype(jnp.float32)

    # Transposed one-hot [n_way, Ns_pad] + reciprocal counts, built on device.
    lab = support_labels.astype(jnp.int32)
    oht = (jnp.arange(n_way, dtype=jnp.int32)[:, None] == lab[None, :]
           ).astype(jnp.float32)
    oht = jnp.pad(oht, ((0, 0), (0, ns_pad - ns)))            # padded rows -> 0
    invc = 1.0 / jnp.sum(oht, axis=1, keepdims=True)          # [n_way, 1]

    scores = prototypical_scores(xs, xq, w_p, b_p, oht, invc)
    return scores[:nq, :]


# ----------------------------------------------------------------------------
if __name__ == "__main__":
    key = jax.random.PRNGKey(0)
    k_w, k_s, k_q = jax.random.split(key, 3)

    # Small problem: 5-way 2-shot, 8 queries, images [C=4, H=16, W=16]
    N_WAY, K_SHOT, N_QUERY = 5, 2, 8
    C, H, W = 4, 16, 16
    D_IN = C * H * W
    D_FEAT = 128

    # Backbone parameters: Flatten + Linear(D_IN -> D_FEAT) + ReLU
    w = jax.random.normal(k_w, (D_IN, D_FEAT), dtype=jnp.float32) * 0.02
    b = jnp.zeros((1, D_FEAT), dtype=jnp.float32)
    params = (w, b)

    support_images = jax.random.normal(
        k_s, (N_WAY * K_SHOT, C, H, W), dtype=jnp.float32)
    query_images = jax.random.normal(k_q, (N_QUERY, C, H, W), dtype=jnp.float32)
    support_labels = jnp.array([0, 1, 2, 3, 4, 0, 1, 2, 3, 4], dtype=jnp.int32)

    scores = prototypical_forward(params, support_images, support_labels,
                                  query_images, n_way=N_WAY)
    scores = jax.block_until_ready(scores)

    # Pure-JAX reference check
    def ref_forward(params, s_img, s_lab, q_img, n_way):
        w, b = params
        zs = jnp.maximum(s_img.reshape(s_img.shape[0], -1) @ w + b, 0.0)
        zq = jnp.maximum(q_img.reshape(q_img.shape[0], -1) @ w + b, 0.0)
        lab = np.asarray(s_lab)
        proto = jnp.stack([zs[lab == c].mean(0) for c in range(n_way)], axis=0)
        dists = jnp.sqrt(((zq[:, None, :] - proto[None, :, :]) ** 2).sum(-1))
        return -dists

    ref = ref_forward(params, support_images, support_labels, query_images, N_WAY)
    assert scores.shape == (N_QUERY, N_WAY), scores.shape
    assert bool(jnp.all(jnp.isfinite(scores)))
    np.testing.assert_allclose(np.asarray(scores), np.asarray(ref),
                               rtol=1e-3, atol=1e-3)

    print("KERNEL_OK")
</pallas_src>

<mosaic_0001>
module attributes {stable_mosaic.version = 11 : i64} {
  func.func @_fused_proto_kernel(%arg0: i32, %arg1: memref<16x512xf32, #tpu.memory_space<vmem>>, %arg2: memref<8x512xf32, #tpu.memory_space<vmem>>, %arg3: memref<512x128xf32, #tpu.memory_space<vmem>>, %arg4: memref<1x128xf32, #tpu.memory_space<vmem>>, %arg5: memref<5x16xf32, #tpu.memory_space<vmem>>, %arg6: memref<5x1xf32, #tpu.memory_space<vmem>>, %arg7: memref<8x5xf32, #tpu.memory_space<vmem>>, %arg8: memref<16x128xf32, #tpu.memory_space<vmem>>, %arg9: memref<8x128xf32, #tpu.memory_space<vmem>>) attributes {dimension_semantics = [#tpu.dimension_semantics<arbitrary>], iteration_bounds = array<i64: 2>, scalar_prefetch = 0 : i64, scratch_operands = 2 : i64, tpu.core_type = #tpu.core_type<tc>, window_params = [{transform_indices = @transform_0, window_bounds = array<i64: 16, 512>}, {transform_indices = @transform_1, window_bounds = array<i64: 8, 512>}, {transform_indices = @transform_2, window_bounds = array<i64: 512, 128>}, {pipeline_mode = #tpu.pipeline_mode<synchronous>, transform_indices = @transform_3, window_bounds = array<i64: 1, 128>}, {pipeline_mode = #tpu.pipeline_mode<synchronous>, transform_indices = @transform_4, window_bounds = array<i64: 5, 16>}, {pipeline_mode = #tpu.pipeline_mode<synchronous>, transform_indices = @transform_5, window_bounds = array<i64: 5, 1>}, {pipeline_mode = #tpu.pipeline_mode<synchronous>, transform_indices = @transform_6, window_bounds = array<i64: 8, 5>}]} {
    %c0_i32 = arith.constant 0 : i32
    %0 = arith.cmpi eq, %arg0, %c0_i32 : i32
    %1 = arith.extui %0 : i1 to i32
    %c0_i32_0 = arith.constant 0 : i32
    %2 = arith.cmpi ne, %1, %c0_i32_0 : i32
    scf.if %2 {
      %cst_16 = arith.constant 0.000000e+00 : f32
      %17 = vector.broadcast %cst_16 : f32 to vector<16x128xf32>
      %c0_17 = arith.constant 0 : index
      %c0_18 = arith.constant 0 : index
      %18 = vector.load %arg8[%c0_17, %c0_18] : memref<16x128xf32, #tpu.memory_space<vmem>>, vector<16x128xf32>
      tpu.vector_store %arg8[%c0_17, %c0_18], %17 {strides = array<i32>} : memref<16x128xf32, #tpu.memory_space<vmem>>, vector<16x128xf32>,
      %cst_19 = arith.constant 0.000000e+00 : f32
      %19 = vector.broadcast %cst_19 : f32 to vector<8x128xf32>
      %c0_20 = arith.constant 0 : index
      %c0_21 = arith.constant 0 : index
      %20 = vector.load %arg9[%c0_20, %c0_21] : memref<8x128xf32, #tpu.memory_space<vmem>>, vector<8x128xf32>
      tpu.vector_store %arg9[%c0_20, %c0_21], %19 {strides = array<i32>} : memref<8x128xf32, #tpu.memory_space<vmem>>, vector<8x128xf32>,
    } else {
    }
    %c0 = arith.constant 0 : index
    %c0_1 = arith.constant 0 : index
    %3 = vector.load %arg3[%c0, %c0_1] : memref<512x128xf32, #tpu.memory_space<vmem>>, vector<512x128xf32>
    %c0_2 = arith.constant 0 : index
    %c0_3 = arith.constant 0 : index
    %4 = vector.load %arg8[%c0_2, %c0_3] : memref<16x128xf32, #tpu.memory_space<vmem>>, vector<16x128xf32>
    %c0_4 = arith.constant 0 : index
    %c0_5 = arith.constant 0 : index
    %5 = vector.load %arg1[%c0_4, %c0_5] : memref<16x512xf32, #tpu.memory_space<vmem>>, vector<16x512xf32>
    %cst = arith.constant dense<0.000000e+00> : vector<16x128xf32>
    %6 = tpu.matmul %5, %3, %cst {dimension_numbers = #tpu.dot_dimension_numbers<[1], [0], [0], [1], [0, 0, 1, 1], [], []>} : vector<16x512xf32>, vector<512x128xf32>, vector<16x128xf32> -> vector<16x128xf32>
    %7 = arith.addf %4, %6 : vector<16x128xf32>
    %c0_6 = arith.constant 0 : index
    %c0_7 = arith.constant 0 : index
    %8 = vector.load %arg8[%c0_6, %c0_7] : memref<16x128xf32, #tpu.memory_space<vmem>>, vector<16x128xf32>
    tpu.vector_store %arg8[%c0_6, %c0_7], %7 {strides = array<i32>} : memref<16x128xf32, #tpu.memory_space<vmem>>, vector<16x128xf32>,
    %c0_8 = arith.constant 0 : index
    %c0_9 = arith.constant 0 : index
    %9 = vector.load %arg9[%c0_8, %c0_9] : memref<8x128xf32, #tpu.memory_space<vmem>>, vector<8x128xf32>
    %c0_10 = arith.constant 0 : index
    %c0_11 = arith.constant 0 : index
    %10 = vector.load %arg2[%c0_10, %c0_11] : memref<8x512xf32, #tpu.memory_space<vmem>>, vector<8x512xf32>
    %cst_12 = arith.constant dense<0.000000e+00> : vector<8x128xf32>
    %11 = tpu.matmul %10, %3, %cst_12 {dimension_numbers = #tpu.dot_dimension_numbers<[1], [0], [0], [1], [0, 0, 1, 1], [], []>} : vector<8x512xf32>, vector<512x128xf32>, vector<8x128xf32> -> vector<8x128xf32>
    %12 = arith.addf %9, %11 : vector<8x128xf32>
    %c0_13 = arith.constant 0 : index
    %c0_14 = arith.constant 0 : index
    %13 = vector.load %arg9[%c0_13, %c0_14] : memref<8x128xf32, #tpu.memory_space<vmem>>, vector<8x128xf32>
    tpu.vector_store %arg9[%c0_13, %c0_14], %12 {strides = array<i32>} : memref<8x128xf32, #tpu.memory_space<vmem>>, vector<8x128xf32>,
    %c1_i32 = arith.constant 1 : i32
    %14 = arith.cmpi eq, %arg0, %c1_i32 : i32
    %15 = arith.extui %14 : i1 to i32
    %c0_i32_15 = arith.constant 0 : i32
    %16 = arith.cmpi ne, %15, %c0_i32_15 : i32
    scf.if %16 {
      %c0_16 = arith.constant 0 : index
      %c0_17 = arith.constant 0 : index
      %17 = vector.load %arg4[%c0_16, %c0_17] : memref<1x128xf32, #tpu.memory_space<vmem>>, vector<1x128xf32>
      %c0_18 = arith.constant 0 : index
      %c0_19 = arith.constant 0 : index
      %18 = vector.load %arg8[%c0_18, %c0_19] : memref<16x128xf32, #tpu.memory_space<vmem>>, vector<16x128xf32>
      %19 = vector.broadcast %17 : vector<1x128xf32> to vector<16x128xf32>
      %20 = arith.addf %18, %19 : vector<16x128xf32>
      %cst_20 = arith.constant 0.000000e+00 : f32
      %21 = vector.broadcast %cst_20 : f32 to vector<16x128xf32>
      %22 = arith.maximumf %20, %21 : vector<16x128xf32>
      %c0_21 = arith.constant 0 : index
      %c0_22 = arith.constant 0 : index
      %23 = vector.load %arg9[%c0_21, %c0_22] : memref<8x128xf32, #tpu.memory_space<vmem>>, vector<8x128xf32>
      %24 = vector.broadcast %17 : vector<1x128xf32> to vector<8x128xf32>
      %25 = arith.addf %23, %24 : vector<8x128xf32>
      %cst_23 = arith.constant 0.000000e+00 : f32
      %26 = vector.broadcast %cst_23 : f32 to vector<8x128xf32>
      %27 = arith.maximumf %25, %26 : vector<8x128xf32>
      %c0_24 = arith.constant 0 : index
      %c0_25 = arith.constant 0 : index
      %28 = vector.load %arg5[%c0_24, %c0_25] : memref<5x16xf32, #tpu.memory_space<vmem>>, vector<5x16xf32>
      %cst_26 = arith.constant dense<0.000000e+00> : vector<5x128xf32>
      %29 = tpu.matmul %28, %22, %cst_26 {dimension_numbers = #tpu.dot_dimension_numbers<[1], [0], [0], [1], [0, 0, 1, 1], [], []>} : vector<5x16xf32>, vector<16x128xf32>, vector<5x128xf32> -> vector<5x128xf32>
      %c0_27 = arith.constant 0 : index
      %c0_28 = arith.constant 0 : index
      %30 = vector.load %arg6[%c0_27, %c0_28] : memref<5x1xf32, #tpu.memory_space<vmem>>, vector<5x1xf32>
      %31 = vector.broadcast %30 : vector<5x1xf32> to vector<5x128xf32>
      %32 = arith.mulf %29, %31 : vector<5x128xf32>
      %33 = arith.mulf %27, %27 : vector<8x128xf32>
      %cst_29 = arith.constant dense<0.000000e+00> : vector<8xf32>
      %34 = vector.multi_reduction <add>, %33, %cst_29 [1] : vector<8x128xf32> to vector<8xf32>
      %35 = vector.shape_cast %34 : vector<8xf32> to vector<8x1xf32>
      %36 = arith.mulf %32, %32 : vector<5x128xf32>
      %cst_30 = arith.constant dense<0.000000e+00> : vector<5xf32>
      %37 = vector.multi_reduction <add>, %36, %cst_30 [1] : vector<5x128xf32> to vector<5xf32>
      %cst_31 = arith.constant dense<0.000000e+00> : vector<8x5xf32>
      %38 = tpu.matmul %27, %32, %cst_31 {dimension_numbers = #tpu.dot_dimension_numbers<[1], [1], [0], [0], [0, 0, 1, 0], [], []>} : vector<8x128xf32>, vector<5x128xf32>, vector<8x5xf32> -> vector<8x5xf32>
      %39 = vector.shape_cast %37 : vector<5xf32> to vector<1x5xf32>
      %40 = vector.broadcast %35 : vector<8x1xf32> to vector<8x5xf32>
      %41 = vector.broadcast %39 : vector<1x5xf32> to vector<8x5xf32>
      %42 = arith.addf %40, %41 : vector<8x5xf32>
      %cst_32 = arith.constant 2.000000e+00 : f32
      %43 = vector.broadcast %cst_32 : f32 to vector<8x5xf32>
      %44 = arith.mulf %43, %38 : vector<8x5xf32>
      %45 = arith.subf %42, %44 : vector<8x5xf32>
      %cst_33 = arith.constant 0.000000e+00 : f32
      %46 = vector.broadcast %cst_33 : f32 to vector<8x5xf32>
      %47 = arith.maximumf %45, %46 : vector<8x5xf32>
      %48 = math.sqrt %47 : vector<8x5xf32>
      %cst_34 = arith.constant 0.000000e+00 : f32
      %49 = vector.broadcast %cst_34 : f32 to vector<8x5xf32>
      %50 = arith.subf %49, %48 : vector<8x5xf32>
      %c0_35 = arith.constant 0 : index
      %c0_36 = arith.constant 0 : index
      %51 = vector.load %arg7[%c0_35, %c0_36] : memref<8x5xf32, #tpu.memory_space<vmem>>, vector<8x5xf32>
      tpu.vector_store %arg7[%c0_35, %c0_36], %50 {strides = array<i32>} : memref<8x5xf32, #tpu.memory_space<vmem>>, vector<8x5xf32>,
    } else {
    }
    return
  }
  func.func @transform_0(%arg0: i32) -> (i32, i32) {
    %c0_i32 = arith.constant 0 : i32
    %c0_i32_0 = arith.constant 0 : i32
    return %c0_i32, %arg0 : i32, i32
  }
  func.func @transform_1(%arg0: i32) -> (i32, i32) {
    %c0_i32 = arith.constant 0 : i32
    %c0_i32_0 = arith.constant 0 : i32
    return %c0_i32, %arg0 : i32, i32
  }
  func.func @transform_2(%arg0: i32) -> (i32, i32) {
    %c0_i32 = arith.constant 0 : i32
    %c0_i32_0 = arith.constant 0 : i32
    return %arg0, %c0_i32 : i32, i32
  }
  func.func @transform_3(%arg0: i32) -> (i32, i32) {
    %c0_i32 = arith.constant 0 : i32
    %c0_i32_0 = arith.constant 0 : i32
    %c0_i32_1 = arith.constant 0 : i32
    return %c0_i32, %c0_i32_0 : i32, i32
  }
  func.func @transform_4(%arg0: i32) -> (i32, i32) {
    %c0_i32 = arith.constant 0 : i32
    %c0_i32_0 = arith.constant 0 : i32
    %c0_i32_1 = arith.constant 0 : i32
    return %c0_i32, %c0_i32_0 : i32, i32
  }
  func.func @transform_5(%arg0: i32) -> (i32, i32) {
    %c0_i32 = arith.constant 0 : i32
    %c0_i32_0 = arith.constant 0 : i32
    %c0_i32_1 = arith.constant 0 : i32
    return %c0_i32, %c0_i32_0 : i32, i32
  }
  func.func @transform_6(%arg0: i32) -> (i32, i32) {
    %c0_i32 = arith.constant 0 : i32
    %c0_i32_0 = arith.constant 0 : i32
    %c0_i32_1 = arith.constant 0 : i32
    return %c0_i32, %c0_i32_0 : i32, i32
  }
}

</mosaic_0001>

<bundles_post_ra>
// kernel: tpu_custom_call.1
= control target key start
LH: loop header
LB: loop body
LE: loop exit
PB: predicated region body
PF: predicated region fallthrough
CT: control target
= control target key end

     0   :  { %s2029_s0 = inlined_call_operand.hbm [shape: f32[16,1024], index: 0, kind: input, shape index: {}]   ;;  %s2030_s1 = inlined_call_operand.hbm [shape: f32[8,1024], index: 1, kind: input, shape index: {}]   ;;  %s2031_s2 = inlined_call_operand.hbm [shape: f32[1024,128], index: 2, kind: input, shape index: {}]   ;;  %s2032_s3 = inlined_call_operand.vmem [shape: f32[1,128], index: 3, kind: input, shape index: {}]   ;;  %s2033_s4 = inlined_call_operand.vmem [shape: f32[5,16], index: 4, kind: input, shape index: {}]   ;;  %s2034_s5 = inlined_call_operand.vmem [shape: f32[5,1], index: 5, kind: input, shape index: {}]   ;;  %s2035_s6 = inlined_call_operand.hbm [shape: f32[8,5], index: 6, kind: output, shape index: {}]  }
   0x1   :  { %2041 = sst [smem:[#allocation18_spill]] %s2029_s0 }
   0x2   :  { %2042 = sst [smem:[#allocation19_spill]] %s2030_s1 }
   0x3   :  { %11 = vsyncpa [#allocation5], 0 }
   0x4   :  { %13 = vsyncpa [#allocation5 + $0x1], 0 }
   0x5   :  { %14 = vsyncpa [#allocation8], 0 }
   0x6   :  { %16 = vsyncpa [#allocation8 + $0x1], 0 }
   0x7   :  { %17 = vsyncpa [#allocation6], 0  ;;  %s1490_s21 = smov 0   ;;  %s1492_s22 = smov 0  }
   0x8   :  { %s1494_s23 = smov 0   ;;  %s1496_s24 = smov 0  }
   0x9 LB: > { %s1509_s25 = sadd.s32 4294967295, %s1440_s24   ;;  %s1512_s26 = sadd.s32 1, %s1440_s24   ;;  %s1440_s24 = sphi %s1496_s24, %s2065_s24   ;;  %s1436_s23 = sphi %s1494_s23, %s2064_s23   ;;  %s1432_s22 = sphi %s1492_s22, %s2063_s22   ;;  %s1428_s21 = sphi %s1490_s21, %s2062_s21  }
   0xa   : > { %s27_s27 = ssub.s32 %s1440_s24, %s1512_s26  ;;  %s30_s28 = sadd.s32 1, %s1436_s23 }
   0xb   : > { %p28_p0 = scmp.eq.s32.totalorder %s27_s27, 0  ;;  %p37_p1 = scmp.ne.s32.totalorder %s1436_s23, %s1432_s22 }
   0xc   : > { %p38_p2 = scmp.eq.s32.totalorder %s1440_s24, 0  ;;  %p43_p3 = scmp.ne.s32.totalorder %s1432_s22, %s1428_s21 }
   0xd   : > { %s1522_s29 = scalar_select %p28_p0, %s1436_s23, %s30_s28  }
   0xe   : > { %p39_p4 = por %p38_p2, %p37_p1  ;;  %p44_p5 = scmp.eq.s32.totalorder %s1509_s25, 0 }
   0xf   : > { %p1242_p6 = scmp.lt.s32.totalorder %s1440_s24, 2  ;;  %s1531_s7 = sand.u32 1, %s1436_s23  }
  0x10   : > { %p1526_p7 = por %p44_p5, %p43_p3  ;;  %s1056_s9 = sshll.u32 %s1440_s24, 9 }
  0x11   : > { %s2044_s0 = sld [smem:[#allocation18_spill]]  ;;  %p1540_p8 = pnand %p1242_p6, %p39_p4 }
  0x12   : > { %s2043_s30 = scalar_select %p1526_p7, 1, 0 }
  0x13   : > { %s233_s14 = sand.u32 1, %s1440_s24   ;;  %s1038_s15 = sshll.u32 %s1531_s7, 5 }
  0x14   : > { %s2046_s1 = sld [smem:[#allocation19_spill]]  ;;  %s237_s19 = scalar_lea.vmem [#allocation7], %s1038_s15 }
  0x15   : > { %s245_s20 = sshll.u32 %s237_s19, 4  ;;  %s1553_s27 = scalar_lea.sflag [#allocation8], %s233_s14  ;;  %s246_s20 = int_to_ptr.vmem [resolvable:$true] %s245_s20 }
  0x16   : > { %p1559_p11 = pneg %p1540_p8 }
  0x17   : > { %s1538_s12 = scalar_lea.hbm %s2044_s0, %s1056_s9 }
  0x1a   : > { %s1549_s18 = scalar_lea.hbm %s2046_s1, %s1056_s9  ;;  %s1295_s15 = scalar_lea.hbm %s2046_s1, 1024 }
  0x1b   : > { %s1290_s28 = scalar_lea.hbm %s1549_s18, 512  ;;  %p1296_p0 = scmp.lt.s32.totalorder %s1549_s18, %s2046_s1 }
  0x1c   : > { %p1291_p10 = scmp.ne.s32.totalorder %s1549_s18, %s1290_s28  ;;  %p1297_p1 = scmp.lt.s32.totalorder %s1295_s15, %s1290_s28 }
  0x1e   : > { %p1293_p12 = pnand %p1559_p11, %p1291_p10  ;;  %p1298_p2 = por %p1297_p1, %p1296_p0 }
  0x20   : > { %p1294_p13 = pneg %p1293_p12 }
  0x22   : > { %p1299_p3 = pnand %p1298_p2, %p1294_p13 }
  0x24   : > { %1302 = shalt.err (!%p1299_p3)
}
  0x25   : > { %s1303_s14 = scalar_lea.vmem %s246_s20, 512  ;;  %s1442_s19 = smov [#allocation7]  }
  0x26   : > { %p1304_p4 = scmp.ne.s32.totalorder %s246_s20, %s1303_s14  ;;  %s1308_s21 = sshll.u32 %s1442_s19, 4  ;;  %s1309_s21 = int_to_ptr.vmem [resolvable:$false] %s1308_s21 }
  0x27   : > { %s1310_s8 = scalar_lea.vmem %s1309_s21, 1024  ;;  %p1311_p10 = scmp.lt.s32.totalorder %s246_s20, %s1309_s21 }
  0x28   : > { %p1306_p5 = pnand %p1304_p4, %p1559_p11  ;;  %p1312_p12 = scmp.lt.s32.totalorder %s1310_s8, %s1303_s14 }
  0x2a   : > { %p1307_p6 = pneg %p1306_p5  ;;  %p1313_p9 = por %p1312_p12, %p1311_p10 }
  0x2c   : > { %p1314_p7 = pnand %p1313_p9, %p1307_p6 }
  0x2e   : > { %1317 = shalt.err (!%p1314_p7)
}
  0x2f   : > { %1238 = dma.hbm_to_vmem [thread:$0]  (!%p1540_p8), %s1549_s18, 512, %s246_s20, %s1553_s27  }
  0x30   : > { %p271_p13 = scmp.lt.s32.totalorder %s1440_s24, 3  ;;  %p2048_p0 = scmp.ge.s32.totalorder %s1440_s24, 1 }
  0x31   : > { %s2050_s21 = sshll.u32 %s1531_s7, 6  ;;  %s213_s11 = scalar_lea.sflag [#allocation5], %s1531_s7 }
  0x32   : > { %p1581_p1 = pnand %p2048_p0, %p271_p13  ;;  %s216_s28 = scalar_lea.vmem [#allocation4], %s2050_s21 }
  0x33   : > { %s223_s9 = sshll.u32 %s216_s28, 4  ;;  %s1318_s15 = scalar_lea.hbm %s1538_s12, 1024  ;;  %s1587_s9 = int_to_ptr.vmem [resolvable:$true] %s223_s9 }
  0x34   : > { %s2049_s8 = scalar_select %p1581_p1, 1, 0 }
  0x35   : > { %p1319_p7 = scmp.ne.s32.totalorder %s1538_s12, %s1318_s15  ;;  %s1323_s18 = scalar_lea.hbm %s2044_s0, 2048 }
  0x36   : > { %p1324_p3 = scmp.lt.s32.totalorder %s1538_s12, %s2044_s0  ;;  %p1325_p4 = scmp.lt.s32.totalorder %s1323_s18, %s1318_s15 }
  0x37   : > { %p1321_p9 = pnand %p1319_p7, %p1559_p11 }
  0x38   : > { %p1326_p5 = por %p1325_p4, %p1324_p3 }
  0x39   : > { %p1322_p2 = pneg %p1321_p9 }
  0x3b   : > { %p1327_p6 = pnand %p1326_p5, %p1322_p2 }
  0x3d   : > { %1330 = shalt.err (!%p1327_p6)
}
  0x3e   : > { %s1331_s19 = scalar_lea.vmem %s1587_s9, 1024  ;;  %s1443_s21 = smov [#allocation4]  }
  0x3f   : > { %p1332_p10 = scmp.ne.s32.totalorder %s1587_s9, %s1331_s19  ;;  %s1336_s28 = sshll.u32 %s1443_s21, 4  ;;  %s1337_s28 = int_to_ptr.vmem [resolvable:$false] %s1336_s28 }
  0x40   : > { %s1338_s16 = scalar_lea.vmem %s1337_s28, 2048  ;;  %p1339_p0 = scmp.lt.s32.totalorder %s1587_s9, %s1337_s28 }
  0x41   : > { %p1334_p12 = pnand %p1332_p10, %p1559_p11  ;;  %p1340_p7 = scmp.lt.s32.totalorder %s1338_s16, %s1331_s19 }
  0x43   : > { %p1335_p13 = pneg %p1334_p12  ;;  %p1341_p9 = por %p1340_p7, %p1339_p0 }
  0x45   : > { %p1342_p1 = pnand %p1341_p9, %p1335_p13 }
  0x47   : > { %1345 = shalt.err (!%p1342_p1)
}
  0x48   : > { %s1444_s15 = smov 1024   ;;  %s1445_s17 = smov 512  }
  0x49   : > { %s1446_s18 = smov 32   ;;  %s1058_s20 = sshll.u32 %s1440_s24, 13 }
  0x4a   : > { %1235 = dma.hbm_to_vmem [thread:$0]  (!%p1540_p8), %s1538_s12, 1024, %s1587_s9, %s213_s11, %s1444_s15, %s1445_s17, %s1446_s18  }
  0x4b   : > { %s2051_s14 = sshll.u32 %s1531_s7, 9  ;;  %s1618_s0 = scalar_lea.hbm %s2031_s2, %s1058_s20 }
  0x4c   : > { %s256_s21 = scalar_lea.vmem [#allocation9], %s2051_s14  ;;  %s1346_s1 = scalar_lea.hbm %s1618_s0, 8192 }
  0x4d   : > { %s263_s19 = sshll.u32 %s256_s21, 4  ;;  %p1347_p1 = scmp.ne.s32.totalorder %s1618_s0, %s1346_s1  ;;  %s1620_s19 = int_to_ptr.vmem [resolvable:$true] %s263_s19 }
  0x4e   : > { %s1351_s7 = scalar_lea.hbm %s2031_s2, 16384  ;;  %p1352_p4 = scmp.lt.s32.totalorder %s1618_s0, %s2031_s2 }
  0x4f   : > { %p1349_p2 = pnand %p1347_p1, %p1559_p11  ;;  %p1353_p5 = scmp.lt.s32.totalorder %s1351_s7, %s1346_s1 }
  0x51   : > { %p1350_p3 = pneg %p1349_p2  ;;  %p1354_p6 = por %p1353_p5, %p1352_p4 }
  0x53   : > { %p1355_p10 = pnand %p1354_p6, %p1350_p3 }
  0x55   : > { %1358 = shalt.err (!%p1355_p10)
}
  0x56   : > { %s1359_s15 = scalar_lea.vmem %s1620_s19, 8192  ;;  %s1447_s17 = smov [#allocation9]  }
  0x57   : > { %p1360_p12 = scmp.ne.s32.totalorder %s1620_s19, %s1359_s15  ;;  %s1364_s18 = sshll.u32 %s1447_s17, 4  ;;  %s1365_s18 = int_to_ptr.vmem [resolvable:$false] %s1364_s18 }
  0x58   : > { %s1366_s20 = scalar_lea.vmem %s1365_s18, 16384  ;;  %p1367_p7 = scmp.lt.s32.totalorder %s1620_s19, %s1365_s18 }
  0x59   : > { %p1362_p13 = pnand %p1360_p12, %p1559_p11  ;;  %p1368_p9 = scmp.lt.s32.totalorder %s1366_s20, %s1359_s15 }
  0x5b   : > { %p1363_p0 = pneg %p1362_p13  ;;  %p1369_p1 = por %p1368_p9, %p1367_p7 }
  0x5d   : > { %p1370_p2 = pnand %p1369_p1, %p1363_p0 }
  0x5f   : > { %1373 = shalt.err (!%p1370_p2)
}
  0x60   : > { %s1448_s1 = smov 128   ;;  %s1449_s14 = smov 8  }
  0x61   : > { %1241 = dma.hbm_to_vmem [thread:$0]  (!%p1540_p8), %s1618_s0, 8192, %s1620_s19, %s1553_s27, %s1448_s1, %s1448_s1, %s1449_s14  }
  0x62   : > { %p2052_p11 = scmp.ne.s32.totalorder %s2049_s8, 0 }
  0x64   : > { %275 = sbr.rel (%p2052_p11) target bundleno = 837 (0x345), region = 44 }
  0x69   : > { %s277_s10 = sand.u32 1, %s1432_s22   ;;  %p2053_p3 = scmp.ne.s32.totalorder %s2043_s30, 0 }
  0x6a   : > { %s1045_s21 = sshll.u32 %s277_s10, 6  ;;  %s278_s28 = scalar_lea.sflag [#allocation5], %s277_s10 }
  0x6b   : > { %s1646_s16 = scalar_lea.vmem [#allocation4], %s1045_s21 }
  0x6c   : > { %1415 = dma.done.wait (%p2053_p3), %s278_s28, 1024  }
  0x6d   : > { %1417 = vsyncadd (%p2053_p3), %s278_s28, 4294966272  ;;  %s286_s12 = sand.u32 1, %s1509_s25   ;;  %s1046_s13 = sshll.u32 %s277_s10, 5 }
  0x6e   : > { %s287_s0 = scalar_lea.sflag [#allocation8], %s286_s12  ;;  %s1653_s27 = scalar_lea.vmem [#allocation7], %s1046_s13 }
  0x6f   : > { %1419 = dma.done.wait (%p2053_p3), %s287_s0, 8704  }
  0x70   : > { %1421 = vsyncadd (%p2053_p3), %s287_s0, 4294958592  ;;  %s1047_s8 = sshll.u32 %s277_s10, 9  ;;  %p1048_p8 = scmp.ne.s32.totalorder %s1509_s25, 0 }
  0x71   : > { %s1659_s19 = scalar_lea.vmem [#allocation9], %s1047_s8 }
  0x72   : > { %339 = sbr.rel (%p1048_p8) target bundleno = 122 (0x7a), region = 60 }
  0x77   : > { %v1450_v0 = vmov 0.0  }
  0x78   : > { %340 = vst [vmem:[#allocation2] sm:$0xff] %v1450_v0  ;;  %341 = vst [vmem:[#allocation2 + $0x8] sm:$0xff] %v1450_v0 }
  0x79   : > { %342 = vst [vmem:[#allocation3] sm:$0xff] %v1450_v0 }
  0x7a PF: > { %v1663_v1 = vld [vmem:[%s1659_s19 + $0xf8] sm:$0xff]  ;;  %v1677_v5 = vld [vmem:[%s1659_s19 + $0xf0] sm:$0xff]  ;;  %v1691_v9 = vld [vmem:[%s1659_s19 + $0xe8] sm:$0xff]  ;;  %p1049_p4 = scmp.ne.s32.totalorder %s1509_s25, 1 }
  0x7b   : > { %v1666_v2 = vld [vmem:[%s1659_s19 + $0x1f8] sm:$0xff]  ;;  %1059 = vmatprep.subr.mxu0 %v1663_v1  ;;  %v1680_v6 = vld [vmem:[%s1659_s19 + $0x1f0] sm:$0xff]  ;;  %v1696_v10 = vld [vmem:[%s1659_s19 + $0x1e8] sm:$0xff] }
  0x7c   : > { %v1669_v3 = vld [vmem:[%s1659_s19 + $0x78] sm:$0xff]  ;;  %1097 = vmatprep.subr.mxu1 %v1666_v2  ;;  %v1685_v7 = vld [vmem:[%s1659_s19 + $0x70] sm:$0xff]  ;;  %v1699_v11 = vld [vmem:[%s1659_s19 + $0x68] sm:$0xff] }
  0x7d   : > { %v1674_v4 = vld [vmem:[%s1659_s19 + $0x178] sm:$0xff]  ;;  %1060 = vmatpush3.msra.mxu0 %v1669_v3  ;;  %v1688_v8 = vld [vmem:[%s1659_s19 + $0x170] sm:$0xff]  ;;  %v1702_v12 = vld [vmem:[%s1659_s19 + $0x168] sm:$0xff] }
  0x7e   : > { %1098 = vmatpush3.msra.mxu1 %v1674_v4  ;;  %1061 = vmatprep.subr.mxu0 %v1677_v5  ;;  %v1707_v13 = vld [vmem:[%s1659_s19 + $0xe0] sm:$0xff]  ;;  %v1723_v17 = vld [vmem:[%s1659_s19 + $0xd8] sm:$0xff]  ;;  %v1739_v21 = vld [vmem:[%s1659_s19 + $0xd0] sm:$0xff] }
  0x7f   : > { %1099 = vmatprep.subr.mxu1 %v1680_v6  ;;  %1062 = vmatpush3.msra.mxu0 %v1685_v7  ;;  %v1710_v14 = vld [vmem:[%s1659_s19 + $0x1e0] sm:$0xff]  ;;  %v1726_v18 = vld [vmem:[%s1659_s19 + $0x1d8] sm:$0xff]  ;;  %v1742_v22 = vld [vmem:[%s1659_s19 + $0x1d0] sm:$0xff] }
  0x80   : > { %1100 = vmatpush3.msra.mxu1 %v1688_v8  ;;  %1063 = vmatprep.subr.mxu0 %v1691_v9  ;;  %v1715_v15 = vld [vmem:[%s1659_s19 + $0x60] sm:$0xff]  ;;  %v1731_v19 = vld [vmem:[%s1659_s19 + $0x58] sm:$0xff]  ;;  %v1747_v23 = vld [vmem:[%s1659_s19 + $0x50] sm:$0xff] }
  0x81   : > { %1101 = vmatprep.subr.mxu1 %v1696_v10  ;;  %v1718_v16 = vld [vmem:[%s1659_s19 + $0x160] sm:$0xff]  ;;  %1064 = vmatpush3.msra.mxu0 %v1699_v11  ;;  %v1734_v20 = vld [vmem:[%s1659_s19 + $0x158] sm:$0xff]  ;;  %v1750_v24 = vld [vmem:[%s1659_s19 + $0x150] sm:$0xff] }
  0x82   : > { %1102 = vmatpush3.msra.mxu1 %v1702_v12  ;;  %1065 = vmatprep.subr.mxu0 %v1707_v13  ;;  %v1755_v25 = vld [vmem:[%s1659_s19 + $0xc8] sm:$0xff]  ;;  %v1771_v29 = vld [vmem:[%s1659_s19 + $0xc0] sm:$0xff]  ;;  %v1787_v33 = vld [vmem:[%s1659_s19 + $0xb8] sm:$0xff] }
  0x83   : > { %1103 = vmatprep.subr.mxu1 %v1710_v14  ;;  %1066 = vmatpush3.msra.mxu0 %v1715_v15  ;;  %v1758_v26 = vld [vmem:[%s1659_s19 + $0x1c8] sm:$0xff]  ;;  %v1774_v30 = vld [vmem:[%s1659_s19 + $0x1c0] sm:$0xff]  ;;  %v1790_v34 = vld [vmem:[%s1659_s19 + $0x1b8] sm:$0xff] }
  0x84   : > { %1104 = vmatpush3.msra.mxu1 %v1718_v16  ;;  %1067 = vmatprep.subr.mxu0 %v1723_v17  ;;  %v1763_v27 = vld [vmem:[%s1659_s19 + $0x48] sm:$0xff]  ;;  %v1779_v31 = vld [vmem:[%s1659_s19 + $0x40] sm:$0xff]  ;;  %v1795_v35 = vld [vmem:[%s1659_s19 + $0x38] sm:$0xff] }
  0x85   : > { %1105 = vmatprep.subr.mxu1 %v1726_v18  ;;  %1068 = vmatpush3.msra.mxu0 %v1731_v19  ;;  %v1766_v28 = vld [vmem:[%s1659_s19 + $0x148] sm:$0xff]  ;;  %v1782_v32 = vld [vmem:[%s1659_s19 + $0x140] sm:$0xff]  ;;  %v1798_v36 = vld [vmem:[%s1659_s19 + $0x138] sm:$0xff] }
  0x86   : > { %1106 = vmatpush3.msra.mxu1 %v1734_v20  ;;  %1069 = vmatprep.subr.mxu0 %v1739_v21  ;;  %v1803_v37 = vld [vmem:[%s1659_s19 + $0xb0] sm:$0xff]  ;;  %v1819_v41 = vld [vmem:[%s1659_s19 + $0xa8] sm:$0xff]  ;;  %v1835_v45 = vld [vmem:[%s1659_s19 + $0xa0] sm:$0xff] }
  0x87   : > { %1107 = vmatprep.subr.mxu1 %v1742_v22  ;;  %1070 = vmatpush3.msra.mxu0 %v1747_v23  ;;  %v1806_v38 = vld [vmem:[%s1659_s19 + $0x1b0] sm:$0xff]  ;;  %v1822_v42 = vld [vmem:[%s1659_s19 + $0x1a8] sm:$0xff]  ;;  %v1838_v46 = vld [vmem:[%s1659_s19 + $0x1a0] sm:$0xff] }
  0x88   : > { %1108 = vmatpush3.msra.mxu1 %v1750_v24  ;;  %1071 = vmatprep.subr.mxu0 %v1755_v25  ;;  %v1811_v39 = vld [vmem:[%s1659_s19 + $0x30] sm:$0xff]  ;;  %v1827_v43 = vld [vmem:[%s1659_s19 + $0x28] sm:$0xff]  ;;  %v1843_v47 = vld [vmem:[%s1659_s19 + $0x20] sm:$0xff] }
  0x89   : > { %1109 = vmatprep.subr.mxu1 %v1758_v26  ;;  %1072 = vmatpush3.msra.mxu0 %v1763_v27  ;;  %v1814_v40 = vld [vmem:[%s1659_s19 + $0x130] sm:$0xff]  ;;  %v1830_v44 = vld [vmem:[%s1659_s19 + $0x128] sm:$0xff]  ;;  %v1846_v48 = vld [vmem:[%s1659_s19 + $0x120] sm:$0xff] }
  0x8a   : > { %1110 = vmatpush3.msra.mxu1 %v1766_v28  ;;  %1073 = vmatprep.subr.mxu0 %v1771_v29  ;;  %v1851_v49 = vld [vmem:[%s1659_s19 + $0x98] sm:$0xff]  ;;  %v1867_v53 = vld [vmem:[%s1659_s19 + $0x90] sm:$0xff]  ;;  %v1883_v57 = vld [vmem:[%s1659_s19 + $0x88] sm:$0xff] }
  0x8b   : > { %1111 = vmatprep.subr.mxu1 %v1774_v30  ;;  %1074 = vmatpush3.msra.mxu0 %v1779_v31  ;;  %v1854_v50 = vld [vmem:[%s1659_s19 + $0x198] sm:$0xff]  ;;  %2054 = vst [vmem:[#allocation14_spill] sm:$0xff] %v1867_v53  ;;  %v1870_v54 = vld [vmem:[%s1659_s19 + $0x190] sm:$0xff]  ;;  %v1886_v58 = vld [vmem:[%s1659_s19 + $0x188] sm:$0xff] }
  0x8c   : > { %1112 = vmatpush3.msra.mxu1 %v1782_v32  ;;  %1075 = vmatprep.subr.mxu0 %v1787_v33  ;;  %v1859_v51 = vld [vmem:[%s1659_s19 + $0x18] sm:$0xff]  ;;  %2055 = vst [vmem:[#allocation15_spill] sm:$0xff] %v1870_v54  ;;  %v1875_v55 = vld [vmem:[%s1659_s19 + $0x10] sm:$0xff]  ;;  %v1891_v59 = vld [vmem:[%s1659_s19 + $0x8] sm:$0xff] }
  0x8d   : > { %1113 = vmatprep.subr.mxu1 %v1790_v34  ;;  %1076 = vmatpush3.msra.mxu0 %v1795_v35  ;;  %v1862_v52 = vld [vmem:[%s1659_s19 + $0x118] sm:$0xff]  ;;  %2056 = vst [vmem:[#allocation16_spill] sm:$0xff] %v1875_v55  ;;  %v1878_v56 = vld [vmem:[%s1659_s19 + $0x110] sm:$0xff]  ;;  %v1894_v60 = vld [vmem:[%s1659_s19 + $0x108] sm:$0xff] }
  0x8e   : > { %1114 = vmatpush3.msra.mxu1 %v1798_v36  ;;  %1077 = vmatprep.subr.mxu0 %v1803_v37  ;;  %2057 = vst [vmem:[#allocation17_spill] sm:$0xff] %v1878_v56  ;;  %v1899_v61 = vld [vmem:[%s1659_s19 + $0x80] sm:$0xff]  ;;  %v410_v0 = vld [vmem:[%s1646_s16 + $0x8] sm:$0xff] }
  0x8f   : > { %1115 = vmatprep.subr.mxu1 %v1806_v38  ;;  %1078 = vmatpush3.msra.mxu0 %v1811_v39  ;;  %v1902_v62 = vld [vmem:[%s1659_s19 + $0x180] sm:$0xff] }
  0x90   : > { %1116 = vmatpush3.msra.mxu1 %v1814_v40  ;;  %1079 = vmatprep.subr.mxu0 %v1819_v41  ;;  %v1907_v63 = vld [vmem:[%s1659_s19] sm:$0xff] }
  0x91   : > { %1117 = vmatprep.subr.mxu1 %v1822_v42  ;;  %1080 = vmatpush3.msra.mxu0 %v1827_v43 }
  0x92   : > { %1118 = vmatpush3.msra.mxu1 %v1830_v44  ;;  %1081 = vmatprep.subr.mxu0 %v1835_v45 }
  0x93   : > { %1119 = vmatprep.subr.mxu1 %v1838_v46  ;;  %1082 = vmatpush3.msra.mxu0 %v1843_v47 }
  0x94   : > { %1120 = vmatpush3.msra.mxu1 %v1846_v48  ;;  %1083 = vmatprep.subr.mxu0 %v1851_v49 }
  0x95   : > { %1121 = vmatprep.subr.mxu1 %v1854_v50  ;;  %1084 = vmatpush3.msra.mxu0 %v1859_v51 }
  0x96   : > { %1122 = vmatpush3.msra.mxu1 %v1862_v52  ;;  %1085 = vmatprep.subr.mxu0 %v1867_v53  ;;  %v411_v53 = vld [vmem:[%s1646_s16 + $0x10] sm:$0xff] }
  0x97   : > { %1123 = vmatprep.subr.mxu1 %v1870_v54  ;;  %1086 = vmatpush3.msra.mxu0 %v1875_v55  ;;  %v1913_v54 = vld [vmem:[%s1659_s19 + $0x100] sm:$0xff]  ;;  %v412_v55 = vld [vmem:[%s1646_s16 + $0x18] sm:$0xff] }
  0x98   : > { %1124 = vmatpush3.msra.mxu1 %v1878_v56  ;;  %1087 = vmatprep.subr.mxu0 %v1883_v57  ;;  %v409_v56 = vld [vmem:[%s1646_s16] sm:$0xff] }
  0x99   : > { %1125 = vmatprep.subr.mxu1 %v1886_v58  ;;  %1088 = vmatpush3.msra.mxu0 %v1891_v59 }
  0x9a   : > { %1126 = vmatpush3.msra.mxu1 %v1894_v60  ;;  %1089 = vmatprep.subr.mxu0 %v1899_v61 }
  0x9b   : > { %1127 = vmatprep.subr.mxu1 %v1902_v62  ;;  %1090 = vmatpush3.msra.mxu0 %v1907_v63 }
  0x9c   : > { %481 = vmatprep.mubr.f32.mxu0 %v410_v0  ;;  %1128 = vmatpush3.msra.mxu1 %v1913_v54 }
  0x9d   : > { %556 = vmatprep.mubr.f32.mxu1 %v412_v55  ;;  %482 = vmatmul.mubr.f32.vlgmr.msra.gmra.mxu0 %v409_v56 }
  0x9e   : > { %557 = vmatmul.mubr.f32.vlgmr.msra.gmra.mxu1 %v411_v53  ;;  %1135 = vmatprep.subr.mxu0 %v1663_v1  ;;  %v414_v1 = vld [vmem:[%s1646_s16 + $0x28] sm:$0xff] }
  0x9f   : > { %1170 = vmatprep.subr.mxu1 %v1666_v2  ;;  %1136 = vmatpush3.msra.mxu0 %v1669_v3  ;;  %v416_v2 = vld [vmem:[%s1646_s16 + $0x38] sm:$0xff]  ;;  %v413_v3 = vld [vmem:[%s1646_s16 + $0x20] sm:$0xff] }
  0xa0   : > { %1171 = vmatpush3.msra.mxu1 %v1674_v4  ;;  %1137 = vmatprep.subr.mxu0 %v1677_v5  ;;  %v415_v4 = vld [vmem:[%s1646_s16 + $0x30] sm:$0xff]  ;;  %v2058_v5 = vld [vmem:[#allocation14_spill] sm:$0xff] }
  0xa1   : > { %1172 = vmatprep.subr.mxu1 %v1680_v6  ;;  %1138 = vmatpush3.msra.mxu0 %v1685_v7  ;;  %v2059_v6 = vld [vmem:[#allocation15_spill] sm:$0xff]  ;;  %v2060_v7 = vld [vmem:[#allocation16_spill] sm:$0xff] }
  0xa2   : > { %1173 = vmatpush3.msra.mxu1 %v1688_v8  ;;  %1139 = vmatprep.subr.mxu0 %v1691_v9  ;;  %v2061_v8 = vld [vmem:[#allocation17_spill] sm:$0xff]  ;;  %v573_v9 = vld [vmem:[%s1653_s27 + $0x8] sm:$0xff] }
  0xa3   : > { %1174 = vmatprep.subr.mxu1 %v1696_v10  ;;  %1140 = vmatpush3.msra.mxu0 %v1699_v11  ;;  %v575_v10 = vld [vmem:[%s1653_s27 + $0x18] sm:$0xff]  ;;  %v572_v11 = vld [vmem:[%s1653_s27] sm:$0xff] }
  0xa4   : > { %1175 = vmatpush3.msra.mxu1 %v1702_v12  ;;  %1141 = vmatprep.subr.mxu0 %v1707_v13  ;;  %v574_v12 = vld [vmem:[%s1653_s27 + $0x10] sm:$0xff] }
  0xa5   : > { %1176 = vmatprep.subr.mxu1 %v1710_v14  ;;  %1142 = vmatpush3.msra.mxu0 %v1715_v15 }
  0xa6   : > { %1177 = vmatpush3.msra.mxu1 %v1718_v16  ;;  %1143 = vmatprep.subr.mxu0 %v1723_v17 }
  0xa7   : > { %1178 = vmatprep.subr.mxu1 %v1726_v18  ;;  %1144 = vmatpush3.msra.mxu0 %v1731_v19  ;;  %v407_v19 = vld [vmem:[#allocation2] sm:$0xff] }
  0xa8   : > { %1179 = vmatpush3.msra.mxu1 %v1734_v20  ;;  %1145 = vmatprep.subr.mxu0 %v1739_v21 }
  0xa9   : > { %1180 = vmatprep.subr.mxu1 %v1742_v22  ;;  %1146 = vmatpush3.msra.mxu0 %v1747_v23 }
  0xaa   : > { %1181 = vmatpush3.msra.mxu1 %v1750_v24  ;;  %1147 = vmatprep.subr.mxu0 %v1755_v25 }
  0xab   : > { %1182 = vmatprep.subr.mxu1 %v1758_v26  ;;  %1148 = vmatpush3.msra.mxu0 %v1763_v27 }
  0xac   : > { %1183 = vmatpush3.msra.mxu1 %v1766_v28  ;;  %1149 = vmatprep.subr.mxu0 %v1771_v29  ;;  %v408_v28 = vld [vmem:[#allocation2 + $0x8] sm:$0xff] }
  0xad   : > { %1184 = vmatprep.subr.mxu1 %v1774_v30  ;;  %1150 = vmatpush3.msra.mxu0 %v1779_v31 }
  0xae   : > { %1185 = vmatpush3.msra.mxu1 %v1782_v32  ;;  %1151 = vmatprep.subr.mxu0 %v1787_v33 }
  0xaf   : > { %1186 = vmatprep.subr.mxu1 %v1790_v34  ;;  %1152 = vmatpush3.msra.mxu0 %v1795_v35 }
  0xb0   : > { %1187 = vmatpush3.msra.mxu1 %v1798_v36  ;;  %1153 = vmatprep.subr.mxu0 %v1803_v37  ;;  %v571_v37 = vld [vmem:[#allocation3] sm:$0xff] }
  0xb1   : > { %1188 = vmatprep.subr.mxu1 %v1806_v38  ;;  %1154 = vmatpush3.msra.mxu0 %v1811_v39 }
  0xb2   : > { %1189 = vmatpush3.msra.mxu1 %v1814_v40  ;;  %1155 = vmatprep.subr.mxu0 %v1819_v41 }
  0xb3   : > { %1190 = vmatprep.subr.mxu1 %v1822_v42  ;;  %1156 = vmatpush3.msra.mxu0 %v1827_v43 }
  0xb4   : > { %1191 = vmatpush3.msra.mxu1 %v1830_v44  ;;  %1157 = vmatprep.subr.mxu0 %v1835_v45 }
  0xb5   : > { %1192 = vmatprep.subr.mxu1 %v1838_v46  ;;  %1158 = vmatpush3.msra.mxu0 %v1843_v47 }
  0xb6   : > { %1193 = vmatpush3.msra.mxu1 %v1846_v48  ;;  %1159 = vmatprep.subr.mxu0 %v1851_v49 }
  0xb7   : > { %1194 = vmatprep.subr.mxu1 %v1854_v50  ;;  %486 = vmatprep.mubr.f32.mxu0 %v414_v1 }
  0xb8   : > { %561 = vmatprep.mubr.f32.mxu1 %v416_v2  ;;  %1160 = vmatpush3.msra.mxu0 %v1859_v51 }
  0xb9   : > { %1195 = vmatpush3.msra.mxu1 %v1862_v52  ;;  %487 = vmatmul.mubr.f32.gmra.mxu0 %v413_v3 }
  0xba   : > { %562 = vmatmul.mubr.f32.gmra.mxu1 %v415_v4  ;;  %1161 = vmatprep.subr.mxu0 %v2058_v5 }
  0xbb   : > { %1196 = vmatprep.subr.mxu1 %v2059_v6  ;;  %1162 = vmatpush3.msra.mxu0 %v2060_v7 }
  0xbc   : > { %1197 = vmatpush3.msra.mxu1 %v2061_v8  ;;  %1163 = vmatprep.subr.mxu0 %v1883_v57 }
  0xbd   : > { %1198 = vmatprep.subr.mxu1 %v1886_v58  ;;  %1164 = vmatpush3.msra.mxu0 %v1891_v59 }
  0xbe   : > { %1199 = vmatpush3.msra.mxu1 %v1894_v60  ;;  %1165 = vmatprep.subr.mxu0 %v1899_v61 }
  0xbf   : > { %1200 = vmatprep.subr.mxu1 %v1902_v62  ;;  %1166 = vmatpush3.msra.mxu0 %v1907_v63 }
  0xc0   : > { %640 = vmatprep.mubr.f32.mxu0 %v573_v9  ;;  %1201 = vmatpush3.msra.mxu1 %v1913_v54 }
  0xc1   : > { %710 = vmatprep.mubr.f32.mxu1 %v575_v10  ;;  %641 = vmatmul.mubr.f32.vlgmr.msra.gmra.mxu0 %v572_v11 }
  0xc2   : > { %711 = vmatmul.mubr.f32.vlgmr.msra.gmra.mxu1 %v574_v12 }
 0x15d   : > { %v1091_v13 = vpop.f32.mrf.mxu0 }
 0x15e   : > { %v1129_v14 = vpop.f32.mrf.mxu1 }
 0x15f   : > { %v1092_v15 = vpop.f32.mrf.mxu0 }
 0x160   : > { %v1130_v16 = vpop.f32.mrf.mxu1  ;;  %v1093_v17 = vadd.f32 %v1092_v15, %v1091_v13 }
 0x161   : > { %v1131_v18 = vadd.f32 %v1130_v16, %v1129_v14 }
 0x163   : > { %v559_v20 = vadd.f32 %v1131_v18, %v1093_v17 }
 0x165   : > { %v567_v21 = vadd.f32 %v559_v20, %v407_v19 }
 0x167   : > { %569 = vst [vmem:[#allocation2] sm:$0xff] %v567_v21 }
 0x179   : > { %v1094_v22 = vpop.f32.mrf.mxu0 }
 0x17a   : > { %v1132_v23 = vpop.f32.mrf.mxu1 }
 0x17b   : > { %v1095_v24 = vpop.f32.mrf.mxu0 }
 0x17c   : > { %v1133_v25 = vpop.f32.mrf.mxu1  ;;  %v1096_v26 = vadd.f32 %v1095_v24, %v1094_v22 }
 0x17d   : > { %v1134_v27 = vadd.f32 %v1133_v25, %v1132_v23 }
 0x17f   : > { %v564_v29 = vadd.f32 %v1134_v27, %v1096_v26 }
 0x181   : > { %v568_v30 = vadd.f32 %v564_v29, %v408_v28  ;;  %v1167_v31 = vpop.f32.mrf.mxu0 }
 0x182   : > { %v1202_v32 = vpop.f32.mrf.mxu1 }
 0x183   : > { %570 = vst [vmem:[#allocation2 + $0x8] sm:$0xff] %v568_v30  ;;  %v1168_v33 = vpop.f32.mrf.mxu0 }
 0x184   : > { %v1203_v34 = vpop.f32.mrf.mxu1  ;;  %v1169_v35 = vadd.f32 %v1168_v33, %v1167_v31 }
 0x185   : > { %v1204_v36 = vadd.f32 %v1203_v34, %v1202_v32 }
 0x187   : > { %v713_v38 = vadd.f32 %v1204_v36, %v1169_v35  ;;  %721 = sbr.rel (%p1049_p4) target bundleno = 822 (0x336), region = 64 }
 0x189   : > { %v716_v39 = vadd.f32 %v713_v38, %v571_v37 }
 0x18b   : > { %717 = vst [vmem:[#allocation3] sm:$0xff] %v716_v39 }
 0x18c   : > { %v1050_v40 = vld [vmem:[%s2032_s3] ss:$0 sm:$0xff]  ;;  %v724_v41 = vld [vmem:[#allocation2 + $0x8] sm:$0xff]  ;;  %v1451_v43 = vmov 0.0   ;;  %vm1452_vm0 = vmmov 0   ;;  %v1453_v47 = vmov 0   ;;  %v899_v61 = vlaneseq }
 0x18d   : > { %v723_v42 = vld [vmem:[#allocation2] sm:$0xff]  ;;  %1210 = vmatprep.subr.mxu0 %v1451_v43  ;;  %v732_v44 = vadd.f32 %v1050_v40, %v724_v41  ;;  %1214 = vmatprep.mubr.msk.f32.mxu0 %vm1452_vm0, %v1451_v43  ;;  %vm739_vm1 = vcmask 130048   ;;  %vm824_vm2 = vcmask 1044480   ;;  %vm930_vm5 = vcmask 39936  }
 0x18e   : > { %v731_v45 = vadd.f32 %v1050_v40, %v723_v42  ;;  %v813_v46 = vld [vmem:[%s2034_s5] sm:$0x1f]  ;;  %1287 = vset.pattern.permute.xlu0 %v1453_v47  ;;  %1217 = vmatprep.subr.mxu1 %v1451_v43  ;;  %v900_v62 = vand.u32 127, %v899_v61  ;;  %v902_v63 = vshrl.u32 %v899_v61, 7 }
 0x18f   : > { %v734_v48 = vmax.f32 %v732_v44, 0.0  ;;  %816 = vperm.xlu0 %1287, %v813_v46   ;;  %1219 = vmatprep.mubr.msk.f32.mxu1 %vm1452_vm0, %v1451_v43  ;;  %v738_v50 = vld [vmem:[%s2033_s4] sm:$0x1f] }
 0x190   : > { %v733_v49 = vmax.f32 %v731_v45, 0.0  ;;  %v903_v0 = vsub.s32 %v900_v62, %v902_v63 }
 0x191   : > { %1211 = vmatpush3.msra.mxu0 %v734_v48 }
 0x192   : > { %1212 = vmatprep.subr.mxu0 %v1451_v43  ;;  %v735_v51 = vld [vmem:[#allocation3] sm:$0xff] }
 0x193   : > { %1213 = vmatpush3.msra.mxu0 %v733_v49  ;;  %v736_v52 = vadd.f32 %v1050_v40, %v735_v51 }
 0x194   : > { %1215 = vmatmul.mubr.msk.f32.vlgmr.msra.gmra.mxu0 %vm739_vm1, %v738_v50 }
 0x195   : > { %v737_v53 = vmax.f32 %v736_v52, 0.0 }
 0x197   : > { %v820_v54 = vmul.f32 %v737_v53, %v737_v53 }
 0x199   : > { %821 = vadd.xlane.f32.xlu1 %v820_v54 }
 0x20a   : > { %v817_v55 = vpop.permute.xlu0 %816 }
 0x222   : > { %v822_v3 = vpop.xlane.xlu1 %821 }
 0x254   : > { %v809_v56 = vpop.f32.mrf.mxu0 }
 0x255   : > { %v819_v57 = vmul.f32 %v817_v55, %v809_v56 }
 0x256   : > { %v1216_v58 = vpop.f32.mrf.mxu0 }
 0x257   : > { %1218 = vmatpush3.xpose.msra.mxu1 %v819_v57  ;;  %v823_v59 = vmul.f32 %v819_v57, %v819_v57 }
 0x259   : > { %v825_v60 = vsel %vm824_vm2, %v823_v59, 0.0 }
 0x25a   : > { %1220 = vmatmul.mubr.f32.vlgmr.msra.gmra.mxu1 %v737_v53  ;;  %826 = vadd.xlane.f32.xlu0 %v825_v60 }
 0x2e3   : > { %v827_v1 = vpop.xlane.xlu0 %826 }
 0x2e4   : > { %v904_v2 = vrot.slane %v827_v1, %v903_v0 }
 0x2e6   : > { %v918_v5 = vadd.f32 %v904_v2, %v822_v3 }
 0x31a   : > { %v894_v4 = vpop.f32.mrf.mxu1 }
 0x31b   : > { %v919_v6 = vmul.f32 2.0, %v894_v4 }
 0x31c   : > { %v1221_v7 = vpop.f32.mrf.mxu1 }
 0x31d   : > { %v920_v8 = vsub.f32 %v918_v5, %v919_v6 }
 0x31f   : > { %v921_v9 = vmax.f32 %v920_v8, 0.0 }
 0x321   : > { %1288 = vrsqrt.f32 %v921_v9  ;;  %vm924_vm3 = vcmp.eq.f32.partialorder %v921_v9, inf  ;;  %v927_v12 = vand.u32 2147483648, %v921_v9  ;;  %vm926_vm4 = vcmp.eq.f32.partialorder %v921_v9, 0.0 }
 0x32e   : > { %v1289_v10 = vpop.eup %1288 }
 0x32f   : > { %v923_v11 = vmul.f32 %v1289_v10, %v921_v9 }
 0x331   : > { %v925_v13 = vsel %vm924_vm3, %v921_v9, %v923_v11 }
 0x332   : > { %v928_v14 = vsel %vm926_vm4, %v927_v12, %v925_v13 }
 0x333   : > { %v929_v15 = vsub.f32 0.0, %v928_v14 }
 0x335   : > { %931 = vst.msk [vmem:[#allocation10] sm:$0xff] %vm930_vm5, %v929_v15 }
 0x336 PF: > { %p1243_p5 = scmp.eq.s32.totalorder %s1509_s25, 1  ;;  %s1454_s17 = smov [#allocation10]  }
 0x337   : > { %s939_s18 = sshll.u32 %s1454_s17, 4  ;;  %s940_s18 = int_to_ptr.vmem [resolvable:$true] %s939_s18 }
 0x338   : > { %s1374_s20 = scalar_lea.vmem %s940_s18, 128  ;;  %p1381_p13 = scmp.lt.s32.totalorder %s940_s18, %s940_s18 }
 0x339   : > { %p1375_p6 = scmp.ne.s32.totalorder %s940_s18, %s1374_s20  ;;  %p1382_p0 = scmp.lt.s32.totalorder %s1374_s20, %s1374_s20 }
 0x33b   : > { %p1376_p10 = pnand %p1375_p6, %p1243_p5  ;;  %p1383_p7 = por %p1382_p0, %p1381_p13 }
 0x33d   : > { %p1377_p12 = pneg %p1376_p10 }
 0x33f   : > { %p1384_p9 = pnand %p1383_p7, %p1377_p12 }
 0x341   : > { %1387 = shalt.err (!%p1384_p9)
}
 0x342   : > { %1229 = dma.vmem_to_hbm [thread:$0]  (%p1243_p5), %s940_s18, 128, %s2035_s6, [#allocation6]  }
 0x343   : > { %1423 = dma.done.wait (%p1243_p5), [#allocation6], 128  }
 0x344   : > { %1425 = vsyncadd (%p1243_p5), [#allocation6], 4294967168 }
 0x345 PF: > { %p20_p1 = scmp.ge.s32.totalorder %s1512_s26, 4   ;;  %s2062_s21 = smov %s1432_s22 }
 0x346   : > { %s2063_s22 = smov %s1436_s23  ;;  %s2064_s23 = smov %s1522_s29 }
 0x347   : > { %s2065_s24 = smov %s1512_s26  ;;  %22 = sbr.rel (!%p20_p1) target bundleno = 9 (0x9), region = 113 }
 0x34c   :  { %952 = vsyncpa [#allocation5], 1 }
 0x34d   :  { %954 = vsyncpa [#allocation5 + $0x1], 1 }
 0x34e   :  { %955 = vsyncpa [#allocation8], 1 }
 0x34f   :  { %957 = vsyncpa [#allocation8 + $0x1], 1 }
 0x350   :  { %958 = vsyncpa [#allocation6], 1 }
 0x351   :  { %960 = vsyncpa [#allocation6 + $0x1], 1 }

</bundles_post_ra>
